<compile_context>
chip_gen: v5e
topology: v5e:2x2
jax: 0.10.0
libtpu: 0.0.40
codegen_flags: <defaults>
</compile_context>

<pallas_src>
import functools

import jax
import jax.numpy as jnp
from jax import lax
from jax.experimental import pallas as pl
from jax.experimental.pallas import tpu as pltpu

_LANE = 128
_SUB = 8
_CHUNK_COLS = 1024           # per-chunk lane width (8 vregs per f32 temporary)
_BLOCK_COLS_CAP = 8192       # cap on block width (bounds ragged-tail waste)
_BLOCK_TARGET_ELEMS = 1 << 20  # ~4 MiB f32 per x block


def _round_down(a, m):
    return (a // m) * m


def _round_up(a, m):
    return ((a + m - 1) // m) * m


def _asl_kernel(x_ref, y_ref, out_ref, *, gamma_neg, gamma_pos, clip, eps,
                B, L, tb, tl, cr, cc, mask_rows, mask_cols):
    i = pl.program_id(0)          # row-block (parallel)
    j = pl.program_id(1)          # col-block (reduction / arbitrary)

    n_r = tb // cr
    n_c = tl // cc
    n_chunks = n_r * n_c

    row_base = i * tb
    col_base = j * tl

    gp, gn = float(gamma_pos), float(gamma_neg)
    use_int_pow = (gp.is_integer() and gn.is_integer()
                   and 0 <= gp <= 16 and 0 <= gn <= 16)

    def _hinted(off, align):
        # Alignment hint only for traced offsets (they are true multiples).
        if isinstance(off, int):
            return off
        return pl.multiple_of(off, align)

    def chunk_loss(r, c):
        ro = _hinted(r * cr, cr)
        co = _hinted(c * cc, cc)
        xs = x_ref[pl.ds(ro, cr), pl.ds(co, cc)].astype(jnp.float32)
        yv = y_ref[pl.ds(ro, cr), pl.ds(co, cc)].astype(jnp.float32)

        # y is a multi-label *binarized* target -> treat as a boolean mask.
        y_pos = yv > 0.5

        xs_neg = 1.0 - xs
        if clip is not None and clip > 0:
            xs_neg = jnp.minimum(xs_neg + jnp.float32(clip), 1.0)

        # For binary y the BCE term collapses to a single log, and pt == p_sel.
        p_sel = jnp.where(y_pos, xs, xs_neg)
        logp = jnp.log(jnp.maximum(p_sel, jnp.float32(eps)))

        one_m_pt = 1.0 - p_sel
        if use_int_pow:
            # Default gammas (4, 1) are integers: integer_pow -> pure VPU
            # multiplies, no EUP work, and 0**0 == 1 exactly like torch.pow.
            w = jnp.where(y_pos, one_m_pt ** int(gp), one_m_pt ** int(gn))
        else:
            g = jnp.where(y_pos, jnp.float32(gp), jnp.float32(gn))
            safe = jnp.maximum(one_m_pt, jnp.float32(1e-30))
            w = jnp.exp(g * jnp.log(safe))

        loss = logp * w

        # Mask the ragged row/col tails of partial boundary blocks (only the
        # statically-needed masks are generated; garbage -> exactly 0).
        valid = None
        if mask_rows:
            rid = (row_base + r * cr
                   + lax.broadcasted_iota(jnp.int32, (cr, cc), 0))
            valid = rid < B
        if mask_cols:
            cid = (col_base + c * cc
                   + lax.broadcasted_iota(jnp.int32, (cr, cc), 1))
            cok = cid < L
            valid = cok if valid is None else (valid & cok)
        if valid is not None:
            loss = jnp.where(valid, loss, jnp.float32(0.0))
        return loss

    if n_chunks == 1:
        acc = chunk_loss(0, 0)
    else:
        def body(idx, a):
            return a + chunk_loss(idx // n_c, idx % n_c)
        unroll = next(u for u in (8, 4, 2, 1) if n_chunks % u == 0)
        acc = lax.fori_loop(0, n_chunks, body,
                            jnp.zeros((cr, cc), jnp.float32), unroll=unroll)

    # Fold lane groups -> (cr, 128) with pure vreg adds (static lane-aligned
    # slices, no XLU reduce, no relayout).
    if cc % _LANE == 0 and cc > _LANE:
        folded = acc[:, :_LANE]
        for g in range(1, cc // _LANE):
            folded = folded + acc[:, g * _LANE:(g + 1) * _LANE]
    else:
        folded = acc

    # Accumulate across the column (reduction) axis into the resident output
    # block; init on the first column block.
    @pl.when(j == 0)
    def _():
        out_ref[...] = jnp.zeros_like(out_ref)

    out_ref[...] += folded


def asymmetric_loss(x, y, gamma_neg=4, gamma_pos=1, clip=0.05, eps=1e-08):
    """AsymmetricLoss.forward on TPU. Returns scalar -loss.sum(axis=1).mean().

    x: probabilities (the module never applies sigmoid despite its docstring).
    y: multi-label binarized (0/1) targets.  Pass y (and optionally x) in a
       narrow dtype (bf16 / int8) to cut HBM traffic; the kernel upcasts.
    """
    assert x.shape == y.shape and x.ndim == 2
    B, L = x.shape
    if not (gamma_neg > 0 or gamma_pos > 0):
        # TODO(synk): when both gammas are 0 PyTorch returns the un-reduced
        # elementwise loss tensor; only the reduced (default) path is built.
        raise NotImplementedError("un-reduced path (gamma_neg=gamma_pos=0)")

    # ---- chunk geometry (what one streaming fori step holds in vregs) ------
    cr = B if B < _SUB else _SUB
    cc = L if L < _LANE else min(_round_down(L, _LANE), _CHUNK_COLS)

    # ---- block geometry (one grid step's DMA); never exceeds the array -----
    max_rows = B if B < _SUB else _round_down(B, _SUB)
    max_cols = _round_down(L, cc) if L >= cc else cc
    tl = min(max_cols,
             _round_down(_BLOCK_COLS_CAP, cc),
             _round_down(_BLOCK_TARGET_ELEMS // max(cr, _SUB), cc))
    tl = max(tl, cc)
    tb = max(cr, min(max_rows, _round_down(_BLOCK_TARGET_ELEMS // tl, cr)))

    n_i = pl.cdiv(B, tb)
    n_j = pl.cdiv(L, tl)

    # Give v7x's two TensorCores >=2 parallel row blocks on mid-size inputs.
    if n_i == 1 and B >= 2 * _SUB:
        tb = min(max_rows, _round_up((B + 1) // 2, cr))
        n_i = pl.cdiv(B, tb)

    mask_rows = (B % tb) != 0
    mask_cols = (L % tl) != 0
    out_w = _LANE if cc % _LANE == 0 else cc

    kernel = functools.partial(
        _asl_kernel,
        gamma_neg=float(gamma_neg),
        gamma_pos=float(gamma_pos),
        clip=clip,
        eps=float(eps),
        B=B, L=L, tb=tb, tl=tl, cr=cr, cc=cc,
        mask_rows=mask_rows, mask_cols=mask_cols,
    )

    out_rows = n_i * cr
    bytes_accessed = int(x.size) * x.dtype.itemsize \
        + int(y.size) * y.dtype.itemsize + out_rows * out_w * 4
    cost = pl.CostEstimate(flops=14 * B * L, transcendentals=B * L,
                           bytes_accessed=bytes_accessed)

    partials = pl.pallas_call(
        kernel,
        out_shape=jax.ShapeDtypeStruct((out_rows, out_w), jnp.float32),
        grid_spec=pltpu.PrefetchScalarGridSpec(
            num_scalar_prefetch=0,
            grid=(n_i, n_j),
            in_specs=[
                pl.BlockSpec((tb, tl), lambda i, j: (i, j)),
                pl.BlockSpec((tb, tl), lambda i, j: (i, j)),
            ],
            out_specs=pl.BlockSpec((cr, out_w), lambda i, j: (i, 0)),
        ),
        compiler_params=pltpu.CompilerParams(
            dimension_semantics=("parallel", "arbitrary"),
            vmem_limit_bytes=32 * 1024 * 1024,
        ),
        cost_estimate=cost,
    )(x, y)

    # Tiny epilogue in JAX:  -loss.sum() / B  ==  -loss.sum(axis=1).mean()
    return -jnp.sum(partials) / jnp.float32(B)


def _reference(x, y, gamma_neg=4, gamma_pos=1, clip=0.05, eps=1e-08):
    x = x.astype(jnp.float32)
    y = y.astype(jnp.float32)
    xs_pos = x
    xs_neg = 1.0 - x
    xs_neg = jnp.minimum(xs_neg + clip, 1.0)
    los_pos = y * jnp.log(jnp.maximum(xs_pos, eps))
    los_neg = (1.0 - y) * jnp.log(jnp.maximum(xs_neg, eps))
    loss = los_pos + los_neg
    pt = xs_pos * y + xs_neg * (1.0 - y)
    g = gamma_pos * y + gamma_neg * (1.0 - y)
    loss = loss * jnp.power(1.0 - pt, g)
    return -loss.sum(axis=1).mean()


if __name__ == "__main__":
    key = jax.random.PRNGKey(0)

    # (B, L) cases: aligned, ragged rows+cols, fori path + v7x split, unroll=4.
    cases = [(4, 256), (10, 200), (24, 384), (64, 256)]
    for B, L in cases:
        key, kx, ky = jax.random.split(key, 3)
        # x: probabilities in (0, 1); y: binarized targets kept in bf16
        # (exact for 0/1, halves the kernel's HBM read traffic for y).
        x = jax.random.uniform(kx, (B, L), dtype=jnp.float32,
                               minval=1e-4, maxval=1.0 - 1e-4)
        y = (jax.random.uniform(ky, (B, L)) < 0.3).astype(jnp.bfloat16)

        out = asymmetric_loss(x, y)
        out = jax.block_until_ready(out)

        ref = _reference(x, y)
        assert jnp.allclose(out, ref, rtol=1e-4, atol=1e-4), (B, L, out, ref)

    print("KERNEL_OK")
</pallas_src>

<mosaic_0001>
module attributes {stable_mosaic.version = 11 : i64} {
  func.func @_asl_kernel(%arg0: i32, %arg1: i32, %arg2: memref<4x256xf32, #tpu.memory_space<vmem>>, %arg3: memref<4x256xbf16, #tpu.memory_space<vmem>>, %arg4: memref<4x128xf32, #tpu.memory_space<vmem>>) attributes {dimension_semantics = [#tpu.dimension_semantics<parallel>, #tpu.dimension_semantics<arbitrary>], iteration_bounds = array<i64: 1, 1>, scalar_prefetch = 0 : i64, scratch_operands = 0 : i64, tpu.core_type = #tpu.core_type<tc>, window_params = [{transform_indices = @transform_0, window_bounds = array<i64: 4, 256>}, {transform_indices = @transform_1, window_bounds = array<i64: 4, 256>}, {transform_indices = @transform_2, window_bounds = array<i64: 4, 128>}]} {
    %c0 = arith.constant 0 : index
    %c0_0 = arith.constant 0 : index
    %0 = vector.load %arg2[%c0, %c0_0] : memref<4x256xf32, #tpu.memory_space<vmem>>, vector<4x256xf32>
    %c0_1 = arith.constant 0 : index
    %c0_2 = arith.constant 0 : index
    %1 = vector.load %arg3[%c0_1, %c0_2] : memref<4x256xbf16, #tpu.memory_space<vmem>>, vector<4x256xbf16>
    %2 = arith.extf %1 : vector<4x256xbf16> to vector<4x256xf32>
    %cst = arith.constant 5.000000e-01 : f32
    %3 = vector.broadcast %cst : f32 to vector<4x256xf32>
    %4 = arith.cmpf ogt, %2, %3 : vector<4x256xf32>
    %cst_3 = arith.constant 1.000000e+00 : f32
    %5 = vector.broadcast %cst_3 : f32 to vector<4x256xf32>
    %6 = arith.subf %5, %0 : vector<4x256xf32>
    %cst_4 = arith.constant 5.000000e-02 : f32
    %7 = vector.broadcast %cst_4 : f32 to vector<4x256xf32>
    %8 = arith.addf %6, %7 : vector<4x256xf32>
    %cst_5 = arith.constant 1.000000e+00 : f32
    %9 = vector.broadcast %cst_5 : f32 to vector<4x256xf32>
    %10 = arith.minimumf %8, %9 : vector<4x256xf32>
    %11 = arith.select %4, %0, %10 : vector<4x256xi1>, vector<4x256xf32>
    %cst_6 = arith.constant 9.99999993E-9 : f32
    %12 = vector.broadcast %cst_6 : f32 to vector<4x256xf32>
    %13 = arith.maximumf %11, %12 : vector<4x256xf32>
    %14 = math.log %13 : vector<4x256xf32>
    %cst_7 = arith.constant 1.000000e+00 : f32
    %15 = vector.broadcast %cst_7 : f32 to vector<4x256xf32>
    %16 = arith.subf %15, %11 : vector<4x256xf32>
    %17 = arith.mulf %16, %16 : vector<4x256xf32>
    %18 = arith.mulf %17, %17 : vector<4x256xf32>
    %19 = arith.select %4, %16, %18 : vector<4x256xi1>, vector<4x256xf32>
    %20 = arith.mulf %14, %19 : vector<4x256xf32>
    %21 = vector.extract_strided_slice %20 {offsets = [0, 0], sizes = [4, 128], strides = [1, 1]} : vector<4x256xf32> to vector<4x128xf32>
    %22 = vector.extract_strided_slice %20 {offsets = [0, 128], sizes = [4, 128], strides = [1, 1]} : vector<4x256xf32> to vector<4x128xf32>
    %23 = arith.addf %21, %22 : vector<4x128xf32>
    %c0_i32 = arith.constant 0 : i32
    %24 = arith.cmpi eq, %arg1, %c0_i32 : i32
    %25 = arith.extui %24 : i1 to i32
    %c0_i32_8 = arith.constant 0 : i32
    %26 = arith.cmpi ne, %25, %c0_i32_8 : i32
    scf.if %26 {
      %cst_13 = arith.constant 0.000000e+00 : f32
      %30 = vector.broadcast %cst_13 : f32 to vector<4x128xf32>
      %c0_14 = arith.constant 0 : index
      %c0_15 = arith.constant 0 : index
      %31 = vector.load %arg4[%c0_14, %c0_15] : memref<4x128xf32, #tpu.memory_space<vmem>>, vector<4x128xf32>
      tpu.vector_store %arg4[%c0_14, %c0_15], %30 {strides = array<i32>} : memref<4x128xf32, #tpu.memory_space<vmem>>, vector<4x128xf32>,
    } else {
    }
    %c0_9 = arith.constant 0 : index
    %c0_10 = arith.constant 0 : index
    %27 = vector.load %arg4[%c0_9, %c0_10] : memref<4x128xf32, #tpu.memory_space<vmem>>, vector<4x128xf32>
    %28 = arith.addf %27, %23 : vector<4x128xf32>
    %c0_11 = arith.constant 0 : index
    %c0_12 = arith.constant 0 : index
    %29 = vector.load %arg4[%c0_11, %c0_12] : memref<4x128xf32, #tpu.memory_space<vmem>>, vector<4x128xf32>
    tpu.vector_store %arg4[%c0_11, %c0_12], %28 {strides = array<i32>} : memref<4x128xf32, #tpu.memory_space<vmem>>, vector<4x128xf32>,
    return
  }
  func.func @transform_0(%arg0: i32, %arg1: i32) -> (i32, i32) {
    %c0_i32 = arith.constant 0 : i32
    return %arg0, %arg1 : i32, i32
  }
  func.func @transform_1(%arg0: i32, %arg1: i32) -> (i32, i32) {
    %c0_i32 = arith.constant 0 : i32
    return %arg0, %arg1 : i32, i32
  }
  func.func @transform_2(%arg0: i32, %arg1: i32) -> (i32, i32) {
    %c0_i32 = arith.constant 0 : i32
    %c0_i32_0 = arith.constant 0 : i32
    return %arg0, %c0_i32 : i32, i32
  }
}

</mosaic_0001>

<bundles_post_ra>
// kernel: tpu_custom_call.1
= control target key start
LH: loop header
LB: loop body
LE: loop exit
PB: predicated region body
PF: predicated region fallthrough
CT: control target
= control target key end

     0   :  { %7 = vsyncpa [#allocation3], 0  ;;  %s198_s0 = inlined_call_operand.hbm [shape: f32[4,256], index: 0, kind: input, shape index: {}]   ;;  %s199_s1 = inlined_call_operand.hbm [shape: bf16[4,256], index: 1, kind: input, shape index: {}]   ;;  %s200_s2 = inlined_call_operand.hbm [shape: f32[4,128], index: 2, kind: output, shape index: {}]  }
   0x1   :  { %8 = vsyncpa [#allocation6], 0 }
   0x2   :  { %9 = vsyncpa [#allocation4], 0  ;;  %s15_s11 = sshll.u32 %s198_s0, 4  ;;  %s170_s12 = smov [#allocation2]   ;;  %s16_s11 = int_to_ptr.hbm [resolvable:$true] %s15_s11 }
   0x3   :  { %s17_s13 = sshll.u32 %s170_s12, 4  ;;  %s26_s16 = sshll.u32 %s199_s1, 4  ;;  %s18_s13 = int_to_ptr.vmem [resolvable:$true] %s17_s13  ;;  %s27_s16 = int_to_ptr.hbm [resolvable:$true] %s26_s16 }
   0x4   :  { %20 = dma.hbm_to_vmem [thread:$0]  %s16_s11, 128, %s18_s13, [#allocation3]  }
   0x5   :  { %s171_s17 = smov [#allocation5]  }
   0x6   :  { %s28_s18 = sshll.u32 %s171_s17, 4  ;;  %s29_s18 = int_to_ptr.vmem [resolvable:$true] %s28_s18 }
   0x7   :  { %31 = dma.hbm_to_vmem [thread:$0]  %s27_s16, 64, %s29_s18, [#allocation6]  }
   0x8   :  { %164 = dma.done.wait [#allocation3], 128  }
   0x9   :  { %165 = vsyncadd [#allocation3], 4294967168 }
   0xa   :  { %166 = dma.done.wait [#allocation6], 64  }
   0xb   :  { %167 = vsyncadd [#allocation6], 4294967232  ;;  %v172_v0 = vmov 0.0   ;;  %v40_v1 = vld [vmem:[#allocation2] sm:$0xff]  ;;  %v41_v2 = vld [vmem:[#allocation5] sm:$0xf] }
   0xc   :  { %64 = vst [vmem:[#allocation7] sm:$0xf] %v172_v0  ;;  %v42_v3 = vunpack.c.l.bf16 %v41_v2  ;;  %v44_v4 = vsub.f32 1.0, %v40_v1  ;;  %s173_s0 = smov [#allocation7]   ;;  %s75_s21 = sshll.u32 %s200_s2, 4  ;;  %s76_s21 = int_to_ptr.hbm [resolvable:$true] %s75_s21 }
   0xd   :  { %s73_s1 = sshll.u32 %s173_s0, 4  ;;  %s74_s1 = int_to_ptr.vmem [resolvable:$true] %s73_s1 }
   0xe   :  { %v45_v5 = vadd.f32 0.05, %v44_v4  ;;  %vm43_vm0 = vcmp.gt.f32.partialorder %v42_v3, 0.5 }
  0x10   :  { %v46_v6 = vmin.f32 %v45_v5, 1.0 }
  0x12   :  { %v47_v7 = vsel %vm43_vm0, %v40_v1, %v46_v6 }
  0x13   :  { %v48_v8 = vmax.f32 %v47_v7, 1e-08  ;;  %v51_v9 = vsub.f32 1.0, %v47_v7  ;;  %v65_v17 = vld [vmem:[#allocation7] sm:$0xf] }
  0x15   :  { %90 = vlog2.f32 %v48_v8  ;;  %v52_v10 = vmul.f32 %v51_v9, %v51_v9 }
  0x17   :  { %v53_v11 = vmul.f32 %v52_v10, %v52_v10 }
  0x19   :  { %v54_v13 = vsel %vm43_vm0, %v51_v9, %v53_v11 }
  0x1b   :  { %v91_v12 = vpop.eup %90 }
  0x1c   :  { %v50_v14 = vmul.f32 0.6931472, %v91_v12 }
  0x1e   :  { %v55_v15 = vmul.f32 %v54_v13, %v50_v14 }
  0x20   :  { %v57_v16 = vrot.slane %v55_v15, 4 }
  0x22   :  { %v59_v18 = vadd.f32 %v57_v16, %v55_v15 }
  0x24   :  { %v66_v19 = vadd.f32 %v65_v17, %v59_v18 }
  0x26   :  { %67 = vst [vmem:[#allocation7] sm:$0xf] %v66_v19 }
  0x27   :  { %78 = dma.vmem_to_hbm [thread:$0]  %s74_s1, 64, %s76_s21, [#allocation4]  }
  0x28   :  { %168 = dma.done.wait [#allocation4], 64  }
  0x29   :  { %169 = vsyncadd [#allocation4], 4294967232 }
  0x2a   :  { %83 = vsyncpa [#allocation3], 1 }
  0x2b   :  { %84 = vsyncpa [#allocation6], 1 }
  0x2c   :  { %85 = vsyncpa [#allocation4], 1 }

</bundles_post_ra>
